<compile_context>
chip_gen: v5e
topology: v5e:2x2
jax: 0.10.0
libtpu: 0.0.40
codegen_flags: <defaults>
</compile_context>

<pallas_src>
import functools

import jax
import jax.numpy as jnp
from jax.experimental import pallas as pl
from jax.experimental.pallas import tpu as pltpu


def _round_up(x, m):
    return (x + m - 1) // m * m


def _cdiv(a, b):
    return -(-a // b)


# ----------------------------------------------------------------------------
# Batch tiling: lane-aligned tile TB and padded batch B_pad.
# ----------------------------------------------------------------------------
def _choose_batch_tiling(B, tb_max):
    """Pick (TB, B_pad).  TB is a multiple of 128 (lane width), <= tb_max."""
    B128 = _round_up(B, 128)
    tb_max = max(128, _round_up(tb_max, 128))
    if B128 <= 256:
        return B128, B128
    if B128 <= tb_max:
        # Batch fits in one tile: split into two so a second TensorCore (v7x
        # megacore) has work on the "parallel" axis; padding stays <= 128 cols.
        tb = _round_up(_cdiv(B128, 2), 128)
        return tb, _round_up(B128, tb)
    # Large batch: choose among multiple-of-256 tiles, trading padded columns
    # against per-tile grid overhead (~0.35us ~= a few tens of columns of work).
    best_tb, best_cost = 256, None
    for tb in range(256, tb_max + 1, 256):
        b_pad = _round_up(B128, tb)
        cost = (b_pad - B128) + 48 * (b_pad // tb)
        if best_cost is None or cost < best_cost:
            best_tb, best_cost = tb, cost
    return best_tb, _round_up(B128, best_tb)


# ----------------------------------------------------------------------------
# Pallas kernel: fused FM + DNN + sigmoid head, feature-major layout.
# ----------------------------------------------------------------------------
def deepfm_kernel(x_ref, w1_ref, fmw_ref, v2s_ref, b1_ref, w2_ref, b2_ref,
                  w3_ref, b3_ref, wout_ref, hbias_ref, o_ref, *, k_pad):
    x_bf = x_ref[...]                                   # (p_pad, TB) bf16
    x_f32 = x_bf.astype(jnp.float32)                    # same rounded values, f32

    # ---- DNN tower: bf16 operands on the MXU, f32 accumulation. ----
    pre1 = jnp.dot(w1_ref[...], x_bf,
                   preferred_element_type=jnp.float32) + b1_ref[...]     # (h1, TB)
    h = jnp.maximum(pre1, 0.0)
    h = jnp.maximum(jnp.dot(w2_ref[...], h.astype(jnp.bfloat16),
                            preferred_element_type=jnp.float32) + b2_ref[...], 0.0)
    h = jnp.maximum(jnp.dot(w3_ref[...], h.astype(jnp.bfloat16),
                            preferred_element_type=jnp.float32) + b3_ref[...], 0.0)
    dnn_out = jnp.sum(wout_ref[...] * h, axis=0, keepdims=True)          # (1, TB)

    # ---- FM part: small full-f32 dot (cancellation-sensitive). ----
    # fmw rows: [0, k_pad) = fm_v^T (zero-padded), [k_pad, k_pad+1) = w_lin^T,
    # remaining rows zero.  Both slice offsets are 8-sublane aligned.
    fm = jnp.dot(fmw_ref[...], x_f32,
                 preferred_element_type=jnp.float32)                     # (k_pad+8, TB)
    xv = fm[:k_pad, :]                                                   # (k_pad, TB)
    lin = fm[k_pad:k_pad + 1, :]                                         # (1, TB)

    # 0.5 * (||x v||^2 - (x*x) . sum_k v^2)  — reductions stay on VPU/XLU (MXU has
    # no slack, these slots are free filler).
    x2v2 = jnp.sum(v2s_ref[...] * (x_f32 * x_f32), axis=0, keepdims=True)   # (1, TB)
    inter = 0.5 * (jnp.sum(xv * xv, axis=0, keepdims=True) - x2v2)          # (1, TB)

    logit = lin + inter + dnn_out + hbias_ref[0, 0]
    o_ref[...] = jax.nn.sigmoid(logit)                                   # (1, TB) lane-dense


# ----------------------------------------------------------------------------
# Wrapper: packing, padding, grid / BlockSpecs, VMEM budget.
# ----------------------------------------------------------------------------
def deepfm_forward_pallas(combined_t, params, *, tb_max=1024):
    """combined_t: (p, B) feature-major combined features (bf16 or f32)."""
    p, B = combined_t.shape
    h1 = params["w1"].shape[1]
    h2 = params["w2"].shape[1]
    h3 = params["w3"].shape[1]
    k = params["fm_v"].shape[1]

    p_pad = _round_up(p, 16)           # 16 = bf16 sublane-pack friendly
    h1_pad = _round_up(h1, 8)
    h2_pad = _round_up(h2, 8)
    h3_pad = _round_up(h3, 8)
    k_pad = _round_up(k, 8)

    TB, B_pad = _choose_batch_tiling(B, tb_max)
    n_tiles = B_pad // TB

    # Streamed activations: bf16, feature-major, zero-padded.
    xT = jnp.pad(combined_t.astype(jnp.bfloat16),
                 ((0, p_pad - p), (0, B_pad - B)))

    # DNN weights in bf16 (MXU-native); zero-padded rows/cols are inert.
    w1T = jnp.pad(params["w1"].T.astype(jnp.bfloat16),
                  ((0, h1_pad - h1), (0, p_pad - p)))                 # (h1_pad, p_pad)
    w2T = jnp.pad(params["w2"].T.astype(jnp.bfloat16),
                  ((0, h2_pad - h2), (0, h1_pad - h1)))               # (h2_pad, h1_pad)
    w3T = jnp.pad(params["w3"].T.astype(jnp.bfloat16),
                  ((0, h3_pad - h3), (0, h2_pad - h2)))               # (h3_pad, h2_pad)

    # FM weights: full f32, 8-aligned segment boundaries: [v^T (k_pad) ; w_lin^T ; pad].
    fmw = jnp.zeros((k_pad + 8, p_pad), dtype=jnp.float32)
    fmw = fmw.at[:k, :p].set(params["fm_v"].T.astype(jnp.float32))
    fmw = fmw.at[k_pad, :p].set(params["fm_w_lin"].reshape(p).astype(jnp.float32))

    # sum_k v^2 as a (p_pad, 1) column (exact reformulation of (x^2)@(v^2) summed over k).
    v2s = jnp.sum(params["fm_v"].astype(jnp.float32) ** 2, axis=1, keepdims=True)
    v2s = jnp.pad(v2s, ((0, p_pad - p), (0, 0)))

    b1 = jnp.pad(params["b1"].reshape(h1, 1).astype(jnp.float32), ((0, h1_pad - h1), (0, 0)))
    b2 = jnp.pad(params["b2"].reshape(h2, 1).astype(jnp.float32), ((0, h2_pad - h2), (0, 0)))
    b3 = jnp.pad(params["b3"].reshape(h3, 1).astype(jnp.float32), ((0, h3_pad - h3), (0, 0)))
    wout = jnp.pad(params["w_out"].reshape(h3, 1).astype(jnp.float32),
                   ((0, h3_pad - h3), (0, 0)))
    head_bias = (params["fm_b_lin"].reshape(()) +
                 params["bias"].reshape(())).astype(jnp.float32).reshape(1, 1)

    const = lambda i: (0, 0)

    # ---- VMEM budget (v7x only has 64 MiB; 32 MiB scoped default is too small). ----
    bytes_x_tile = p_pad * TB * 2
    bytes_out_tile = TB * 4
    bytes_weights = (w1T.size * 2 + w2T.size * 2 + w3T.size * 2 + fmw.size * 4 +
                     v2s.size * 4 + b1.size * 4 + b2.size * 4 + b3.size * 4 +
                     wout.size * 4)
    bytes_inter = (TB * 4 * (h1_pad + h2_pad + h3_pad + (k_pad + 8) + 8) +
                   TB * 2 * (h1_pad + h2_pad))          # compiler-staged f32/bf16 temps
    vmem_est = 2 * (bytes_x_tile + bytes_out_tile) + 2 * bytes_weights + bytes_inter
    vmem_limit = int(min(max(2 * vmem_est, 32 * 1024 * 1024), 64 * 1024 * 1024))

    flops = 2 * B_pad * (p_pad * (h1_pad + k_pad + 8) + p_pad +
                         h1_pad * h2_pad + h2_pad * h3_pad + h3_pad)
    bytes_accessed = (2 * xT.size + 4 * B_pad + 2 * (w1T.size + w2T.size + w3T.size) +
                      4 * (fmw.size + v2s.size + b1.size + b2.size + b3.size +
                           wout.size + 1))

    out = pl.pallas_call(
        functools.partial(deepfm_kernel, k_pad=k_pad),
        out_shape=jax.ShapeDtypeStruct((1, B_pad), jnp.float32),
        grid=(n_tiles,),
        in_specs=[
            pl.BlockSpec((p_pad, TB), lambda i: (0, i)),   # streamed x^T tile (bf16)
            pl.BlockSpec(w1T.shape, const),                # resident weights
            pl.BlockSpec(fmw.shape, const),
            pl.BlockSpec(v2s.shape, const),
            pl.BlockSpec(b1.shape, const),
            pl.BlockSpec(w2T.shape, const),
            pl.BlockSpec(b2.shape, const),
            pl.BlockSpec(w3T.shape, const),
            pl.BlockSpec(b3.shape, const),
            pl.BlockSpec(wout.shape, const),
            pl.BlockSpec((1, 1), const, memory_space=pltpu.MemorySpace.SMEM),
        ],
        out_specs=pl.BlockSpec((1, TB), lambda i: (0, i)),
        compiler_params=pltpu.CompilerParams(
            dimension_semantics=("parallel",),
            vmem_limit_bytes=vmem_limit),
        cost_estimate=pl.CostEstimate(flops=int(flops),
                                      transcendentals=int(B_pad),
                                      bytes_accessed=int(bytes_accessed)),
    )(xT, w1T, fmw, v2s, b1, w2T, b2, w3T, b3, wout, head_bias)

    return out[0, :B].reshape(B, 1)


# ----------------------------------------------------------------------------
# Parameter initialization (deterministic, mirrors the torch module's shapes).
# ----------------------------------------------------------------------------
def xavier_normal(key, shape):
    fan_in, fan_out = shape[0], shape[1]
    std = (2.0 / (fan_in + fan_out)) ** 0.5
    return std * jax.random.normal(key, shape, dtype=jnp.float32)


def kaiming_normal(key, shape):
    fan_in = shape[0]
    std = (2.0 / fan_in) ** 0.5
    return std * jax.random.normal(key, shape, dtype=jnp.float32)


def init_params(key, vocab_sizes, emb_size, num_dense, hidden_units, fm_k):
    num_sparse = len(vocab_sizes)
    p = emb_size * num_sparse + num_dense
    keys = jax.random.split(key, 16 + num_sparse)
    ki = iter(range(len(keys)))

    params = {}
    params["emb_tables"] = [
        xavier_normal(keys[next(ki)], (vs, emb_size)) for vs in vocab_sizes
    ]
    params["fm_w_lin"] = 0.1 * jax.random.normal(keys[next(ki)], (p, 1),
                                                 dtype=jnp.float32)
    params["fm_b_lin"] = jnp.zeros((1, 1), dtype=jnp.float32)
    params["fm_v"] = xavier_normal(keys[next(ki)], (p, fm_k))
    dims = [p] + hidden_units
    for i in range(3):
        params[f"w{i+1}"] = kaiming_normal(keys[next(ki)], (dims[i], dims[i + 1]))
        params[f"b{i+1}"] = jnp.zeros((1, dims[i + 1]), dtype=jnp.float32)
    params["w_out"] = xavier_normal(keys[next(ki)], (hidden_units[-1], 1))
    params["bias"] = jnp.zeros((1, 1), dtype=jnp.float32)
    return params, p


# ----------------------------------------------------------------------------
# Glue: embedding gather + concat, emitted feature-major (p, B) in bf16 so the
# kernel's lane-dense bf16 layout needs no extra HBM cast/transpose pass.
# ----------------------------------------------------------------------------
def build_combined_t(x, params, num_dense, num_sparse, emb_size):
    cols = [x[:, :num_dense].astype(jnp.float32)]                       # (B, num_dense)
    for j in range(num_sparse):
        idx = x[:, num_dense + j].astype(jnp.int32)                     # (B,)
        cols.append(jnp.take(params["emb_tables"][j], idx, axis=0))     # (B, emb)
    combined = jnp.concatenate(cols, axis=1)                            # (B, p)
    return combined.T.astype(jnp.bfloat16)                              # (p, B) bf16


# ----------------------------------------------------------------------------
# Pure-JAX references for correctness checks.
#   bf16_tower=True mirrors the kernel's numerics (bf16 DNN matmuls, f32 FM);
#   bf16_tower=False is the exact f32 math of the torch module.
# ----------------------------------------------------------------------------
def deepfm_forward_ref(combined, params, *, bf16_tower=False):
    x = combined.astype(jnp.float32)
    lin = x @ params["fm_w_lin"] + params["fm_b_lin"]
    xv = x @ params["fm_v"]
    x2v2 = (x * x) @ (params["fm_v"] * params["fm_v"])
    inter = 0.5 * jnp.sum(xv * xv - x2v2, axis=1, keepdims=True)
    fm_out = lin + inter
    if bf16_tower:
        bf = lambda a: a.astype(jnp.bfloat16)
        h = jnp.maximum(jnp.dot(bf(x), bf(params["w1"]),
                                preferred_element_type=jnp.float32) + params["b1"], 0.0)
        h = jnp.maximum(jnp.dot(bf(h), bf(params["w2"]),
                                preferred_element_type=jnp.float32) + params["b2"], 0.0)
        h = jnp.maximum(jnp.dot(bf(h), bf(params["w3"]),
                                preferred_element_type=jnp.float32) + params["b3"], 0.0)
    else:
        h = jnp.maximum(x @ params["w1"] + params["b1"], 0.0)
        h = jnp.maximum(h @ params["w2"] + params["b2"], 0.0)
        h = jnp.maximum(h @ params["w3"] + params["b3"], 0.0)
    dnn_out = h @ params["w_out"]
    return jax.nn.sigmoid(fm_out + dnn_out + params["bias"])


if __name__ == "__main__":
    # Small, module-consistent shapes.
    B = 8
    num_dense = 3
    vocab_sizes = [10, 20, 15, 8, 12]          # 5 sparse features
    num_sparse = len(vocab_sizes)
    emb_size = 4
    hidden_units = [32, 32, 32]                # scaled-down [400, 400, 400]
    fm_k = 10

    key = jax.random.PRNGKey(0)
    k_param, k_dense, k_sparse = jax.random.split(key, 3)

    params, p = init_params(k_param, vocab_sizes, emb_size, num_dense,
                            hidden_units, fm_k)

    # Input x: (B, num_dense + num_sparse); dense cols floats, sparse cols carry
    # integer ids stored as floats (as in the torch model).
    dense_vals = jax.random.normal(k_dense, (B, num_dense), dtype=jnp.float32)
    sparse_ids = jnp.stack(
        [jax.random.randint(jax.random.fold_in(k_sparse, j), (B,), 0, vocab_sizes[j])
         for j in range(num_sparse)], axis=1).astype(jnp.float32)
    x = jnp.concatenate([dense_vals, sparse_ids], axis=1)              # (B, 8)

    combined_t = build_combined_t(x, params, num_dense, num_sparse, emb_size)  # (p, B) bf16

    out = deepfm_forward_pallas(combined_t, params)
    out = jax.block_until_ready(out)
    assert out.shape == (B, 1)

    combined = combined_t.T  # same (bf16-rounded) values the kernel consumed

    # Tight check vs a reference that mirrors the kernel's bf16-tower / f32-FM numerics.
    ref_matched = deepfm_forward_ref(combined, params, bf16_tower=True)
    assert jnp.allclose(out, ref_matched, atol=1e-4, rtol=1e-4), \
        "mismatch vs precision-matched reference"

    # Loose sanity check vs the exact f32 torch-equivalent math.
    ref_f32 = deepfm_forward_ref(combined, params, bf16_tower=False)
    assert jnp.allclose(out, ref_f32, atol=2e-2, rtol=2e-2), \
        "mismatch vs f32 reference"

    print("KERNEL_OK")
</pallas_src>

<mosaic_0001>
module attributes {stable_mosaic.version = 11 : i64} {
  func.func @deepfm_kernel(%arg0: i32, %arg1: memref<32x128xbf16, #tpu.memory_space<vmem>>, %arg2: memref<32x32xbf16, #tpu.memory_space<vmem>>, %arg3: memref<24x32xf32, #tpu.memory_space<vmem>>, %arg4: memref<32x1xf32, #tpu.memory_space<vmem>>, %arg5: memref<32x1xf32, #tpu.memory_space<vmem>>, %arg6: memref<32x32xbf16, #tpu.memory_space<vmem>>, %arg7: memref<32x1xf32, #tpu.memory_space<vmem>>, %arg8: memref<32x32xbf16, #tpu.memory_space<vmem>>, %arg9: memref<32x1xf32, #tpu.memory_space<vmem>>, %arg10: memref<32x1xf32, #tpu.memory_space<vmem>>, %arg11: memref<1x1xf32, #tpu.memory_space<smem>>, %arg12: memref<1x128xf32, #tpu.memory_space<vmem>>) attributes {dimension_semantics = [#tpu.dimension_semantics<parallel>], iteration_bounds = array<i64: 1>, scalar_prefetch = 0 : i64, scratch_operands = 0 : i64, tpu.core_type = #tpu.core_type<tc>, window_params = [{transform_indices = @transform_0, window_bounds = array<i64: 32, 128>}, {pipeline_mode = #tpu.pipeline_mode<synchronous>, transform_indices = @transform_1, window_bounds = array<i64: 32, 32>}, {pipeline_mode = #tpu.pipeline_mode<synchronous>, transform_indices = @transform_2, window_bounds = array<i64: 24, 32>}, {pipeline_mode = #tpu.pipeline_mode<synchronous>, transform_indices = @transform_3, window_bounds = array<i64: 32, 1>}, {pipeline_mode = #tpu.pipeline_mode<synchronous>, transform_indices = @transform_4, window_bounds = array<i64: 32, 1>}, {pipeline_mode = #tpu.pipeline_mode<synchronous>, transform_indices = @transform_5, window_bounds = array<i64: 32, 32>}, {pipeline_mode = #tpu.pipeline_mode<synchronous>, transform_indices = @transform_6, window_bounds = array<i64: 32, 1>}, {pipeline_mode = #tpu.pipeline_mode<synchronous>, transform_indices = @transform_7, window_bounds = array<i64: 32, 32>}, {pipeline_mode = #tpu.pipeline_mode<synchronous>, transform_indices = @transform_8, window_bounds = array<i64: 32, 1>}, {pipeline_mode = #tpu.pipeline_mode<synchronous>, transform_indices = @transform_9, window_bounds = array<i64: 32, 1>}, {transform_indices = @transform_10, window_bounds = array<i64: 1, 1>}, {transform_indices = @transform_11, window_bounds = array<i64: 1, 128>}]} {
    %c0 = arith.constant 0 : index
    %c0_0 = arith.constant 0 : index
    %0 = vector.load %arg1[%c0, %c0_0] : memref<32x128xbf16, #tpu.memory_space<vmem>>, vector<32x128xbf16>
    %1 = arith.extf %0 : vector<32x128xbf16> to vector<32x128xf32>
    %c0_1 = arith.constant 0 : index
    %c0_2 = arith.constant 0 : index
    %2 = vector.load %arg2[%c0_1, %c0_2] : memref<32x32xbf16, #tpu.memory_space<vmem>>, vector<32x32xbf16>
    %cst = arith.constant dense<0.000000e+00> : vector<32x128xf32>
    %3 = tpu.matmul %2, %0, %cst {dimension_numbers = #tpu.dot_dimension_numbers<[1], [0], [0], [1], [0, 0, 1, 1], [], []>} : vector<32x32xbf16>, vector<32x128xbf16>, vector<32x128xf32> -> vector<32x128xf32>
    %c0_3 = arith.constant 0 : index
    %c0_4 = arith.constant 0 : index
    %4 = vector.load %arg5[%c0_3, %c0_4] : memref<32x1xf32, #tpu.memory_space<vmem>>, vector<32x1xf32>
    %5 = vector.broadcast %4 : vector<32x1xf32> to vector<32x128xf32>
    %6 = arith.addf %3, %5 : vector<32x128xf32>
    %cst_5 = arith.constant 0.000000e+00 : f32
    %7 = vector.broadcast %cst_5 : f32 to vector<32x128xf32>
    %8 = arith.maximumf %6, %7 : vector<32x128xf32>
    %c0_6 = arith.constant 0 : index
    %c0_7 = arith.constant 0 : index
    %9 = vector.load %arg6[%c0_6, %c0_7] : memref<32x32xbf16, #tpu.memory_space<vmem>>, vector<32x32xbf16>
    %10 = arith.truncf %8 : vector<32x128xf32> to vector<32x128xbf16>
    %cst_8 = arith.constant dense<0.000000e+00> : vector<32x128xf32>
    %11 = tpu.matmul %9, %10, %cst_8 {dimension_numbers = #tpu.dot_dimension_numbers<[1], [0], [0], [1], [0, 0, 1, 1], [], []>} : vector<32x32xbf16>, vector<32x128xbf16>, vector<32x128xf32> -> vector<32x128xf32>
    %c0_9 = arith.constant 0 : index
    %c0_10 = arith.constant 0 : index
    %12 = vector.load %arg7[%c0_9, %c0_10] : memref<32x1xf32, #tpu.memory_space<vmem>>, vector<32x1xf32>
    %13 = vector.broadcast %12 : vector<32x1xf32> to vector<32x128xf32>
    %14 = arith.addf %11, %13 : vector<32x128xf32>
    %cst_11 = arith.constant 0.000000e+00 : f32
    %15 = vector.broadcast %cst_11 : f32 to vector<32x128xf32>
    %16 = arith.maximumf %14, %15 : vector<32x128xf32>
    %c0_12 = arith.constant 0 : index
    %c0_13 = arith.constant 0 : index
    %17 = vector.load %arg8[%c0_12, %c0_13] : memref<32x32xbf16, #tpu.memory_space<vmem>>, vector<32x32xbf16>
    %18 = arith.truncf %16 : vector<32x128xf32> to vector<32x128xbf16>
    %cst_14 = arith.constant dense<0.000000e+00> : vector<32x128xf32>
    %19 = tpu.matmul %17, %18, %cst_14 {dimension_numbers = #tpu.dot_dimension_numbers<[1], [0], [0], [1], [0, 0, 1, 1], [], []>} : vector<32x32xbf16>, vector<32x128xbf16>, vector<32x128xf32> -> vector<32x128xf32>
    %c0_15 = arith.constant 0 : index
    %c0_16 = arith.constant 0 : index
    %20 = vector.load %arg9[%c0_15, %c0_16] : memref<32x1xf32, #tpu.memory_space<vmem>>, vector<32x1xf32>
    %21 = vector.broadcast %20 : vector<32x1xf32> to vector<32x128xf32>
    %22 = arith.addf %19, %21 : vector<32x128xf32>
    %cst_17 = arith.constant 0.000000e+00 : f32
    %23 = vector.broadcast %cst_17 : f32 to vector<32x128xf32>
    %24 = arith.maximumf %22, %23 : vector<32x128xf32>
    %c0_18 = arith.constant 0 : index
    %c0_19 = arith.constant 0 : index
    %25 = vector.load %arg10[%c0_18, %c0_19] : memref<32x1xf32, #tpu.memory_space<vmem>>, vector<32x1xf32>
    %26 = vector.broadcast %25 : vector<32x1xf32> to vector<32x128xf32>
    %27 = arith.mulf %26, %24 : vector<32x128xf32>
    %cst_20 = arith.constant dense<0.000000e+00> : vector<128xf32>
    %28 = vector.multi_reduction <add>, %27, %cst_20 [0] : vector<32x128xf32> to vector<128xf32>
    %29 = vector.shape_cast %28 : vector<128xf32> to vector<1x128xf32>
    %c0_21 = arith.constant 0 : index
    %c0_22 = arith.constant 0 : index
    %30 = vector.load %arg3[%c0_21, %c0_22] : memref<24x32xf32, #tpu.memory_space<vmem>>, vector<24x32xf32>
    %cst_23 = arith.constant dense<0.000000e+00> : vector<24x128xf32>
    %31 = tpu.matmul %30, %1, %cst_23 {dimension_numbers = #tpu.dot_dimension_numbers<[1], [0], [0], [1], [0, 0, 1, 1], [], []>} : vector<24x32xf32>, vector<32x128xf32>, vector<24x128xf32> -> vector<24x128xf32>
    %32 = vector.extract_strided_slice %31 {offsets = [0, 0], sizes = [16, 128], strides = [1, 1]} : vector<24x128xf32> to vector<16x128xf32>
    %33 = vector.extract_strided_slice %31 {offsets = [16, 0], sizes = [1, 128], strides = [1, 1]} : vector<24x128xf32> to vector<1x128xf32>
    %c0_24 = arith.constant 0 : index
    %c0_25 = arith.constant 0 : index
    %34 = vector.load %arg4[%c0_24, %c0_25] : memref<32x1xf32, #tpu.memory_space<vmem>>, vector<32x1xf32>
    %35 = arith.mulf %1, %1 : vector<32x128xf32>
    %36 = vector.broadcast %34 : vector<32x1xf32> to vector<32x128xf32>
    %37 = arith.mulf %36, %35 : vector<32x128xf32>
    %cst_26 = arith.constant dense<0.000000e+00> : vector<128xf32>
    %38 = vector.multi_reduction <add>, %37, %cst_26 [0] : vector<32x128xf32> to vector<128xf32>
    %39 = vector.shape_cast %38 : vector<128xf32> to vector<1x128xf32>
    %40 = arith.mulf %32, %32 : vector<16x128xf32>
    %cst_27 = arith.constant dense<0.000000e+00> : vector<128xf32>
    %41 = vector.multi_reduction <add>, %40, %cst_27 [0] : vector<16x128xf32> to vector<128xf32>
    %42 = vector.shape_cast %41 : vector<128xf32> to vector<1x128xf32>
    %43 = arith.subf %42, %39 : vector<1x128xf32>
    %cst_28 = arith.constant 5.000000e-01 : f32
    %44 = vector.broadcast %cst_28 : f32 to vector<1x128xf32>
    %45 = arith.mulf %44, %43 : vector<1x128xf32>
    %46 = arith.addf %33, %45 : vector<1x128xf32>
    %47 = arith.addf %46, %29 : vector<1x128xf32>
    %c0_29 = arith.constant 0 : index
    %c0_30 = arith.constant 0 : index
    %48 = memref.load %arg11[%c0_29, %c0_30] : memref<1x1xf32, #tpu.memory_space<smem>>
    %49 = vector.broadcast %48 : f32 to vector<1x128xf32>
    %50 = arith.addf %47, %49 : vector<1x128xf32>
    %51 = arith.negf %50 : vector<1x128xf32>
    %52 = math.exp %51 : vector<1x128xf32>
    %cst_31 = arith.constant 1.000000e+00 : f32
    %53 = vector.broadcast %cst_31 : f32 to vector<1x128xf32>
    %54 = arith.addf %53, %52 : vector<1x128xf32>
    %55 = arith.divf %53, %54 : vector<1x128xf32>
    %c0_32 = arith.constant 0 : index
    %c0_33 = arith.constant 0 : index
    %56 = vector.load %arg12[%c0_32, %c0_33] : memref<1x128xf32, #tpu.memory_space<vmem>>, vector<1x128xf32>
    tpu.vector_store %arg12[%c0_32, %c0_33], %55 {strides = array<i32>} : memref<1x128xf32, #tpu.memory_space<vmem>>, vector<1x128xf32>,
    return
  }
  func.func @transform_0(%arg0: i32) -> (i32, i32) {
    %c0_i32 = arith.constant 0 : i32
    %c0_i32_0 = arith.constant 0 : i32
    return %c0_i32, %arg0 : i32, i32
  }
  func.func @transform_1(%arg0: i32) -> (i32, i32) {
    %c0_i32 = arith.constant 0 : i32
    %c0_i32_0 = arith.constant 0 : i32
    %c0_i32_1 = arith.constant 0 : i32
    return %c0_i32, %c0_i32_0 : i32, i32
  }
  func.func @transform_2(%arg0: i32) -> (i32, i32) {
    %c0_i32 = arith.constant 0 : i32
    %c0_i32_0 = arith.constant 0 : i32
    %c0_i32_1 = arith.constant 0 : i32
    return %c0_i32, %c0_i32_0 : i32, i32
  }
  func.func @transform_3(%arg0: i32) -> (i32, i32) {
    %c0_i32 = arith.constant 0 : i32
    %c0_i32_0 = arith.constant 0 : i32
    %c0_i32_1 = arith.constant 0 : i32
    return %c0_i32, %c0_i32_0 : i32, i32
  }
  func.func @transform_4(%arg0: i32) -> (i32, i32) {
    %c0_i32 = arith.constant 0 : i32
    %c0_i32_0 = arith.constant 0 : i32
    %c0_i32_1 = arith.constant 0 : i32
    return %c0_i32, %c0_i32_0 : i32, i32
  }
  func.func @transform_5(%arg0: i32) -> (i32, i32) {
    %c0_i32 = arith.constant 0 : i32
    %c0_i32_0 = arith.constant 0 : i32
    %c0_i32_1 = arith.constant 0 : i32
    return %c0_i32, %c0_i32_0 : i32, i32
  }
  func.func @transform_6(%arg0: i32) -> (i32, i32) {
    %c0_i32 = arith.constant 0 : i32
    %c0_i32_0 = arith.constant 0 : i32
    %c0_i32_1 = arith.constant 0 : i32
    return %c0_i32, %c0_i32_0 : i32, i32
  }
  func.func @transform_7(%arg0: i32) -> (i32, i32) {
    %c0_i32 = arith.constant 0 : i32
    %c0_i32_0 = arith.constant 0 : i32
    %c0_i32_1 = arith.constant 0 : i32
    return %c0_i32, %c0_i32_0 : i32, i32
  }
  func.func @transform_8(%arg0: i32) -> (i32, i32) {
    %c0_i32 = arith.constant 0 : i32
    %c0_i32_0 = arith.constant 0 : i32
    %c0_i32_1 = arith.constant 0 : i32
    return %c0_i32, %c0_i32_0 : i32, i32
  }
  func.func @transform_9(%arg0: i32) -> (i32, i32) {
    %c0_i32 = arith.constant 0 : i32
    %c0_i32_0 = arith.constant 0 : i32
    %c0_i32_1 = arith.constant 0 : i32
    return %c0_i32, %c0_i32_0 : i32, i32
  }
  func.func @transform_10(%arg0: i32) -> (i32, i32) {
    %c0_i32 = arith.constant 0 : i32
    %c0_i32_0 = arith.constant 0 : i32
    %c0_i32_1 = arith.constant 0 : i32
    return %c0_i32, %c0_i32_0 : i32, i32
  }
  func.func @transform_11(%arg0: i32) -> (i32, i32) {
    %c0_i32 = arith.constant 0 : i32
    %c0_i32_0 = arith.constant 0 : i32
    return %c0_i32, %arg0 : i32, i32
  }
}

</mosaic_0001>

<bundles_post_ra>
// kernel: tpu_custom_call.1
= control target key start
LH: loop header
LB: loop body
LE: loop exit
PB: predicated region body
PF: predicated region fallthrough
CT: control target
= control target key end

     0   :  { %v520_v3 = vmov 0   ;;  %s716_s0 = inlined_call_operand.vmem [shape: bf16[32,128], index: 0, kind: input, shape index: {}]   ;;  %s717_s1 = inlined_call_operand.vmem [shape: bf16[32,32], index: 1, kind: input, shape index: {}]   ;;  %s718_s2 = inlined_call_operand.vmem [shape: f32[24,32], index: 2, kind: input, shape index: {}]   ;;  %s719_s3 = inlined_call_operand.vmem [shape: f32[32,1], index: 3, kind: input, shape index: {}]   ;;  %s720_s4 = inlined_call_operand.vmem [shape: f32[32,1], index: 4, kind: input, shape index: {}]   ;;  %s721_s5 = inlined_call_operand.vmem [shape: bf16[32,32], index: 5, kind: input, shape index: {}]   ;;  %s722_s6 = inlined_call_operand.vmem [shape: f32[32,1], index: 6, kind: input, shape index: {}]   ;;  %s723_s7 = inlined_call_operand.vmem [shape: bf16[32,32], index: 7, kind: input, shape index: {}]   ;;  %s724_s8 = inlined_call_operand.vmem [shape: f32[32,1], index: 8, kind: input, shape index: {}]   ;;  %s725_s9 = inlined_call_operand.vmem [shape: f32[32,1], index: 9, kind: input, shape index: {}]   ;;  %s726_s10 = inlined_call_operand.<no memory space> [shape: f32[1,1], index: 10, kind: input, shape index: {}]   ;;  %s727_s11 = inlined_call_operand.hbm [shape: f32[1,128], index: 11, kind: output, shape index: {}]  }
   0x1   :  { %v55_v0 = vld [vmem:[%s720_s4 + $0x10] sm:$0xff]  ;;  %v53_v1 = vld [vmem:[%s720_s4] sm:$0xff]  ;;  %v478_v2 = vld [vmem:[%s716_s0 + $0x8] sm:$0xff]  ;;  %488 = vset.pattern.permute.xlu1 %v520_v3  ;;  %487 = vset.pattern.permute.xlu0 %v520_v3 }
   0x2   :  { %v44_v4 = vld [vmem:[%s716_s0 + $0x8] sm:$0xff]   ;;  %v42_v5 = vld [vmem:[%s716_s0] sm:$0xff]   ;;  %69 = vperm.xlu0 %487, %v55_v0   ;;  %59 = vperm.xlu1 %488, %v53_v1   ;;  %v137_v10 = vld [vmem:[%s722_s6 + $0x10] sm:$0xff] }
   0x3   :  { %v597_v6 = vunpack.c.h.bf16 %v44_v4  ;;  %v599_v7 = vunpack.c.l.bf16 %v44_v4  ;;  %112 = vmatpush.bf16.msra.mxu0 %v478_v2  ;;  %v477_v8 = vld [vmem:[%s716_s0] sm:$0xff]  ;;  %489 = vset.pattern.permute.xlu2 %v520_v3  ;;  %v605_v9 = vunpack.c.h.bf16 %v42_v5  ;;  %v56_v11 = vld [vmem:[%s720_s4 + $0x18] sm:$0xff]  ;;  %v54_v12 = vld [vmem:[%s720_s4 + $0x8] sm:$0xff]  ;;  %v620_v14 = vunpack.c.l.bf16 %v42_v5 }
   0x4   :  { %151 = vperm.xlu2 %489, %v137_v10   ;;  %v479_v13 = vld [vmem:[%s717_s1] sm:$0xff] }
   0x5   :  { %328 = vmatpush.msra.mxu3 %v597_v6 }
   0x7   :  { %329 = vmatpush.msra.mxu3 %v599_v7  ;;  %113 = vmatpush.bf16.msra.mxu0 %v477_v8 }
   0x8   :  { %17 = vsyncpa [#allocation4], 0  ;;  %vm99_vm0 = vcmask 261120   ;;  %v304_v15 = vld [vmem:[%s718_s2] sm:$0xff]  ;;  %v138_v16 = vld [vmem:[%s722_s6 + $0x18] sm:$0xff]  ;;  %s521_s15 = smov [#allocation3]  }
   0x9   :  { %330 = vmatpush.msra.mxu3 %v605_v9  ;;  %v135_v17 = vld [vmem:[%s722_s6] sm:$0xff]  ;;  %v136_v18 = vld [vmem:[%s722_s6 + $0x8] sm:$0xff]  ;;  %v306_v24 = vld [vmem:[%s718_s2 + $0x10] sm:$0xff]  ;;  %s424_s0 = sshll.u32 %s521_s15, 4  ;;  %s425_s0 = int_to_ptr.vmem [resolvable:$true] %s424_s0 }
   0xa   :  { %74 = vperm.xlu0 %487, %v56_v11   ;;  %64 = vperm.xlu1 %488, %v54_v12   ;;  %v305_v19 = vld [vmem:[%s718_s2 + $0x8] sm:$0xff]  ;;  %v342_v20 = vld [vmem:[%s719_s3] sm:$0xff]  ;;  %v344_v26 = vld [vmem:[%s719_s3 + $0x10] sm:$0xff] }
   0xb   :  { %451 = vmatmul.msk.bf16.vlgmr.msra.gmra.mxu0 %vm99_vm0, %v479_v13  ;;  %331 = vmatpush.msra.mxu3 %v620_v14  ;;  %v343_v21 = vld [vmem:[%s719_s3 + $0x8] sm:$0xff]  ;;  %v204_v22 = vld [vmem:[%s724_s8] sm:$0xff]  ;;  %v206_v27 = vld [vmem:[%s724_s8 + $0x10] sm:$0xff] }
   0xc   :  { %473 = vmatmul.msk.f32.vlgmr.msra.gmra.mxu3 %vm99_vm0, %v304_v15  ;;  %156 = vperm.xlu2 %489, %v138_v16   ;;  %v480_v23 = vld [vmem:[%s717_s1 + $0x8] sm:$0xff]  ;;  %v345_v28 = vld [vmem:[%s719_s3 + $0x18] sm:$0xff]  ;;  %v267_v30 = vld [vmem:[%s725_s9] sm:$0xff] }
   0xd   :  { %v205_v25 = vld [vmem:[%s724_s8 + $0x8] sm:$0xff]  ;;  %v207_v29 = vld [vmem:[%s724_s8 + $0x18] sm:$0xff]  ;;  %v269_v31 = vld [vmem:[%s725_s9 + $0x10] sm:$0xff] }
   0xe   :  { %v270_v32 = vld [vmem:[%s725_s9 + $0x18] sm:$0xff]  ;;  %v268_v38 = vld [vmem:[%s725_s9 + $0x8] sm:$0xff]  ;;  %v481_v52 = vld [vmem:[%s721_s5] sm:$0xff] }
   0xf   :  { %v482_v53 = vld [vmem:[%s721_s5 + $0x8] sm:$0xff]  ;;  %v483_v11 = vld [vmem:[%s723_s7] sm:$0xff] }
  0x10   :  { %v484_v12 = vld [vmem:[%s723_s7 + $0x8] sm:$0xff] }
  0x12   :  { %141 = vperm.xlu0 %487, %v135_v17   ;;  %146 = vperm.xlu1 %488, %v136_v18   ;;  %v346_v18 = vmul.f32 %v620_v14, %v620_v14 }
  0x14   :  { %474 = vmatmul.msk.f32.gmra.mxu3 %vm99_vm0, %v305_v19  ;;  %352 = vperm.xlu2 %489, %v342_v20   ;;  %v347_v19 = vmul.f32 %v605_v9, %v605_v9 }
  0x1a   :  { %357 = vperm.xlu0 %487, %v343_v21   ;;  %210 = vperm.xlu1 %488, %v204_v22   ;;  %v348_v22 = vmul.f32 %v599_v7, %v599_v7 }
  0x1b   :  { %452 = vmatmul.msk.bf16.gmra.mxu0 %vm99_vm0, %v480_v23 }
  0x1c   :  { %475 = vmatmul.msk.f32.gmra.mxu3 %vm99_vm0, %v306_v24  ;;  %215 = vperm.xlu2 %489, %v205_v25  }
  0x22   :  { %362 = vperm.xlu0 %487, %v344_v26   ;;  %220 = vperm.xlu1 %488, %v206_v27  }
  0x24   :  { %367 = vperm.xlu2 %489, %v345_v28   ;;  %v349_v28 = vmul.f32 %v597_v6, %v597_v6 }
  0x2a   :  { %225 = vperm.xlu0 %487, %v207_v29   ;;  %273 = vperm.xlu1 %488, %v267_v30  }
  0x2c   :  { %278 = vperm.xlu2 %489, %v268_v38  }
  0x32   :  { %283 = vperm.xlu0 %487, %v269_v31   ;;  %288 = vperm.xlu1 %488, %v270_v32  }
  0x5e   :  { %v152_v56 = vpop.permute.xlu2 %151 }
  0x66   :  { %v157_v58 = vpop.permute.xlu2 %156 }
  0x6e   :  { %v353_v13 = vpop.permute.xlu2 %352 }
  0x6f   :  { %v370_v20 = vmul.f32 %v353_v13, %v346_v18 }
  0x74   :  { %v70_v35 = vpop.permute.xlu0 %69  ;;  %v60_v36 = vpop.permute.xlu1 %59 }
  0x76   :  { %v216_v16 = vpop.permute.xlu2 %215 }
  0x7c   :  { %v75_v39 = vpop.permute.xlu0 %74  ;;  %v65_v41 = vpop.permute.xlu1 %64 }
  0x7e   :  { %v368_v27 = vpop.permute.xlu2 %367 }
  0x7f   :  { %v373_v32 = vmul.f32 %v368_v27, %v349_v28 }
  0x84   :  { %v147_v60 = vpop.permute.xlu1 %146  ;;  %v142_v0 = vpop.permute.xlu0 %141 }
  0x88   :  { %v115_v33 = vpop.f32.mrf.mxu0 }
  0x89   :  { %v116_v45 = vadd.f32 %v115_v33, %v60_v36 }
  0x8b   :  { %v125_v50 = vmax.f32 %v116_v45, 0.0 }
  0x8c   :  { %v358_v15 = vpop.permute.xlu0 %357  ;;  %v211_v24 = vpop.permute.xlu1 %210 }
  0x8d   :  { %v371_v21 = vmul.f32 %v358_v15, %v347_v19  ;;  %v397_v19 = vstv %s726_s10  ;;  %s426_s10 = sshll.u32 %s727_s11, 4  ;;  %s427_s10 = int_to_ptr.hbm [resolvable:$true] %s426_s10 }
  0x8f   :  { %v333_v17 = vpop.f32.mrf.mxu3  ;;  %v374_v25 = vadd.f32 %v371_v21, %v370_v20 }
  0x90   :  { %v117_v34 = vpop.f32.mrf.mxu0  ;;  %v383_v31 = vmul.f32 %v333_v17, %v333_v17 }
  0x91   :  { %v118_v43 = vadd.f32 %v117_v34, %v65_v41 }
  0x93   :  { %v126_v48 = vmax.f32 %v118_v43, 0.0 }
  0x94   :  { %v363_v23 = vpop.permute.xlu0 %362 }
  0x95   :  { %v133_v51 = vpack.c.bf16 %v126_v48, %v125_v50  ;;  %v372_v26 = vmul.f32 %v363_v23, %v348_v22  ;;  %v279_v50 = vpop.permute.xlu2 %278 }
  0x97   :  { %v336_v29 = vpop.f32.mrf.mxu3  ;;  %v375_v14 = vadd.f32 %v374_v25, %v372_v26 }
  0x98   :  { %v120_v37 = vpop.f32.mrf.mxu0  ;;  %v384_v33 = vmul.f32 %v336_v29, %v336_v29 }
  0x99   :  { %v121_v40 = vadd.f32 %v120_v37, %v70_v35  ;;  %v376_v9 = vadd.f32 %v375_v14, %v373_v32  ;;  %v221_v35 = vpop.permute.xlu1 %220 }
  0x9a   :  { %v385_v34 = vadd.f32 %v384_v33, %v383_v31 }
  0x9b   :  { %v127_v46 = vmax.f32 %v121_v40, 0.0  ;;  %v377_v37 = vrot.slane %v376_v9, 4 }
  0x9c   :  { %v386_v7 = vrot.slane %v385_v34, 4  ;;  %v226_v38 = vpop.permute.xlu0 %225 }
  0x9e   :  { %v387_v40 = vadd.f32 %v386_v7, %v385_v34 }
  0x9f   :  { %v339_v15 = vpop.f32.mrf.mxu3 }
  0xa0   :  { %v122_v42 = vpop.f32.mrf.mxu0 }
  0xa1   :  { %v123_v44 = vadd.f32 %v122_v42, %v75_v39  ;;  %v378_v39 = vadd.f32 %v377_v37, %v376_v9  ;;  %v274_v6 = vpop.permute.xlu1 %273 }
  0xa3   :  { %v128_v47 = vmax.f32 %v123_v44, 0.0  ;;  %v379_v45 = vrot.slane %v378_v39, 2 }
  0xa5   :  { %v134_v49 = vpack.c.bf16 %v128_v47, %v127_v46  ;;  %v388_v46 = vrot.slane %v387_v40, 2 }
  0xa7   :  { %181 = vmatpush.bf16.msra.mxu1 %v134_v49 }
  0xab   :  { %182 = vmatpush.bf16.msra.mxu1 %v133_v51  ;;  %v380_v51 = vadd.f32 %v379_v45, %v378_v39 }
  0xae   :  { %461 = vmatmul.msk.bf16.vlgmr.msra.gmra.mxu1 %vm99_vm0, %v481_v52  ;;  %v389_v52 = vadd.f32 %v388_v46, %v387_v40 }
  0xbe   :  { %462 = vmatmul.msk.bf16.gmra.mxu1 %vm99_vm0, %v482_v53 }
 0x12b   :  { %v184_v54 = vpop.f32.mrf.mxu1 }
 0x12c   :  { %v185_v1 = vadd.f32 %v184_v54, %v142_v0  ;;  %v284_v54 = vpop.permute.xlu0 %283 }
 0x12e   :  { %v194_v8 = vmax.f32 %v185_v1, 0.0 }
 0x133   :  { %v186_v55 = vpop.f32.mrf.mxu1 }
 0x134   :  { %v187_v62 = vadd.f32 %v186_v55, %v147_v60  ;;  %v390_v60 = vrot.slane %v389_v52, 1 }
 0x136   :  { %v195_v4 = vmax.f32 %v187_v62, 0.0 }
 0x138   :  { %v202_v10 = vpack.c.bf16 %v195_v4, %v194_v8 }
 0x13b   :  { %v189_v57 = vpop.f32.mrf.mxu1 }
 0x13c   :  { %v190_v59 = vadd.f32 %v189_v57, %v152_v56 }
 0x13e   :  { %v196_v2 = vmax.f32 %v190_v59, 0.0  ;;  %v381_v59 = vrot.slane %v380_v51, 1 }
 0x143   :  { %v191_v61 = vpop.f32.mrf.mxu1 }
 0x144   :  { %v192_v63 = vadd.f32 %v191_v61, %v157_v58 }
 0x146   :  { %v197_v3 = vmax.f32 %v192_v63, 0.0  ;;  %v289_v63 = vpop.permute.xlu1 %288 }
 0x148   :  { %v203_v5 = vpack.c.bf16 %v197_v3, %v196_v2  ;;  %v382_v2 = vadd.f32 %v381_v59, %v380_v51  ;;  %v391_v3 = vadd.f32 %v390_v60, %v389_v52 }
 0x14a   :  { %250 = vmatpush.bf16.msra.mxu2 %v203_v5  ;;  %v392_v8 = vsub.f32 %v391_v3, %v382_v2 }
 0x14e   :  { %251 = vmatpush.bf16.msra.mxu2 %v202_v10 }
 0x151   :  { %471 = vmatmul.msk.bf16.vlgmr.msra.gmra.mxu2 %vm99_vm0, %v483_v11 }
 0x161   :  { %472 = vmatmul.msk.bf16.gmra.mxu2 %vm99_vm0, %v484_v12  ;;  %v393_v12 = vmul.f32 0.5, %v392_v8 }
 0x163   :  { %v394_v17 = vadd.f32 %v393_v12, %v339_v15 }
 0x1d4   :  { %v253_v30 = vpop.f32.mrf.mxu2 }
 0x1d5   :  { %v254_v43 = vadd.f32 %v253_v30, %v211_v24 }
 0x1d7   :  { %v263_v48 = vmax.f32 %v254_v43, 0.0 }
 0x1d9   :  { %v291_v56 = vmul.f32 %v274_v6, %v263_v48 }
 0x1dc   :  { %v255_v36 = vpop.f32.mrf.mxu2 }
 0x1dd   :  { %v256_v41 = vadd.f32 %v255_v36, %v216_v16 }
 0x1df   :  { %v264_v47 = vmax.f32 %v256_v41, 0.0 }
 0x1e1   :  { %v292_v53 = vmul.f32 %v279_v50, %v264_v47 }
 0x1e3   :  { %v295_v61 = vadd.f32 %v292_v53, %v291_v56 }
 0x1e4   :  { %v258_v42 = vpop.f32.mrf.mxu2 }
 0x1e5   :  { %v259_v44 = vadd.f32 %v258_v42, %v221_v35 }
 0x1e7   :  { %v265_v49 = vmax.f32 %v259_v44, 0.0 }
 0x1e9   :  { %v293_v57 = vmul.f32 %v284_v54, %v265_v49 }
 0x1eb   :  { %v296_v0 = vadd.f32 %v295_v61, %v293_v57 }
 0x1ec   :  { %v260_v55 = vpop.f32.mrf.mxu2 }
 0x1ed   :  { %v261_v58 = vadd.f32 %v260_v55, %v226_v38 }
 0x1ef   :  { %v266_v62 = vmax.f32 %v261_v58, 0.0 }
 0x1f1   :  { %v294_v1 = vmul.f32 %v289_v63, %v266_v62 }
 0x1f3   :  { %v297_v4 = vadd.f32 %v296_v0, %v294_v1 }
 0x1f5   :  { %v298_v5 = vrot.slane %v297_v4, 4 }
 0x1f7   :  { %v299_v10 = vadd.f32 %v298_v5, %v297_v4 }
 0x1f9   :  { %v300_v11 = vrot.slane %v299_v10, 2 }
 0x1fb   :  { %v301_v13 = vadd.f32 %v300_v11, %v299_v10 }
 0x1fd   :  { %v302_v16 = vrot.slane %v301_v13, 1 }
 0x1ff   :  { %v303_v18 = vadd.f32 %v302_v16, %v301_v13 }
 0x201   :  { %v395_v20 = vadd.f32 %v394_v17, %v303_v18 }
 0x203   :  { %v398_v21 = vadd.f32 %v397_v19, %v395_v20 }
 0x205   :  { %v476_v22 = vmul.f32 -1.442695, %v398_v21 }
 0x207   :  { %490 = vpow2.f32 %v476_v22 }
 0x20d   :  { %v491_v23 = vpop.eup %490 }
 0x20e   :  { %v402_v24 = vadd.f32 1.0, %v491_v23 }
 0x210   :  { %492 = vrcp.f32 %v402_v24  ;;  %v414_v28 = vand.u32 2147483648, %v402_v24  ;;  %v412_v30 = vand.u32 2147483647, %v402_v24  ;;  %vm408_vm2 = vweird.f32 %v402_v24 }
 0x212   :  { %v415_v14 = vor.u32 1.1754944e-38, %v414_v28  ;;  %vm413_vm4 = vcmp.eq.f32.partialorder %v412_v30, 8.507059e+37 }
 0x216   :  { %v493_v25 = vpop.eup %492 }
 0x217   :  { %v404_v26 = vmul.f32 %v493_v25, %v402_v24  ;;  %vm409_vm1 = vweird.f32 %v493_v25 }
 0x218   :  { %vm410_vm3 = vmor %vm408_vm2, %vm409_vm1 }
 0x219   :  { %v405_v27 = vsub.f32 1.0, %v404_v26 }
 0x21b   :  { %v406_v29 = vmul.f32 %v493_v25, %v405_v27 }
 0x21d   :  { %v407_v31 = vadd.f32 %v493_v25, %v406_v29 }
 0x21f   :  { %v411_v32 = vsel %vm410_vm3, %v493_v25, %v407_v31 }
 0x220   :  { %v416_v33 = vsel %vm413_vm4, %v415_v14, %v411_v32 }
 0x221   :  { %418 = vst [vmem:[#allocation3] sm:$0x1] %v416_v33 }
 0x222   :  { %429 = dma.vmem_to_hbm [thread:$0]  %s425_s0, 16, %s427_s10, [#allocation4]  }
 0x223   :  { %518 = dma.done.wait [#allocation4], 16  }
 0x224   :  { %519 = vsyncadd [#allocation4], 4294967280 }
 0x225   :  { %434 = vsyncpa [#allocation4], 1 }

</bundles_post_ra>
